<compile_context>
chip_gen: v5e
topology: v5e:2x2
jax: 0.10.0
libtpu: 0.0.40
codegen_flags: <defaults>
</compile_context>

<pallas_src>
import jax
import jax.numpy as jnp
from jax.experimental import pallas as pl
from jax.experimental.pallas import tpu as pltpu


def _round_up(x: int, m: int) -> int:
    return ((x + m - 1) // m) * m


def _vmem_capacity_bytes() -> int:
    """Per-TensorCore VMEM capacity; conservative fallback = v7x's 64 MiB."""
    try:
        info = pltpu.get_tpu_info()
        cap = getattr(info, "vmem_capacity_bytes", None)
        if cap:
            return int(cap)
    except Exception:
        pass
    return 64 << 20


def _vmem_budget(tm, tk, dm_p, x_isz, w_isz, o_isz):
    """Rough VMEM footprint (bytes) for one grid step, incl. double buffers."""
    b = 0
    b += 2 * tm * dm_p * x_isz      # x tile (double-buffered)
    b += 2 * tm * dm_p * o_isz      # out tile (double-buffered)
    b += 2 * dm_p * tk * w_isz      # W1 tile stream
    b += 2 * tk * dm_p * w_isz      # W2 tile stream
    b += 2 * tk * 4                 # b1 tile stream (f32)
    b += 1 * dm_p * 4               # b2 (resident, single buffer, f32)
    b += tm * dm_p * 4              # f32 accumulator scratch
    b += tm * tk * 4                # f32 hidden intermediate
    b += tm * tk * w_isz            # hidden cast copy for matmul 2
    return b


def _ffn_kernel(x_ref, w1_ref, b1_ref, w2_ref, b2_ref, o_ref, acc_ref):
    k = pl.program_id(1)

    @pl.when(k == 0)
    def _init():
        acc_ref[...] = jnp.zeros_like(acc_ref)

    # linear_1 chunk + ReLU (MXU matmul, f32 accumulation; bias/ReLU on VPU).
    x = x_ref[...].astype(w1_ref.dtype)
    h = jnp.dot(x, w1_ref[...], preferred_element_type=jnp.float32)
    h = jnp.maximum(h + b1_ref[...], 0.0)          # (tm, tk), f32

    # dropout == identity (eval mode)

    # linear_2 partial sum over this hidden chunk.
    acc_ref[...] += jnp.dot(h.astype(w2_ref.dtype), w2_ref[...],
                            preferred_element_type=jnp.float32)

    @pl.when(k == pl.num_programs(1) - 1)
    def _finalize():
        o_ref[...] = (acc_ref[...] + b2_ref[...]).astype(o_ref.dtype)


def position_wise_feed_forward(x, w1, b1, w2, b2, *,
                               tile_m=512, tile_k=512, compute_dtype=None):
    """x: (batch, seq, d_model) -> (batch, seq, d_model).

    w1: (d_model, d_hidden), b1: (d_hidden,)
    w2: (d_hidden, d_model), b2: (d_model,)
    compute_dtype: MXU operand dtype (default: x.dtype). Pass jnp.bfloat16 for
    the fast MXU path; accumulation stays f32.
    """
    batch, seq, d_model = x.shape
    d_hidden = w1.shape[1]
    M = batch * seq
    x2d = x.reshape(M, d_model)

    out_dtype = x.dtype
    compute_dtype = jnp.dtype(x.dtype if compute_dtype is None else compute_dtype)
    x_isz = jnp.dtype(x.dtype).itemsize
    w_isz = compute_dtype.itemsize
    o_isz = jnp.dtype(out_dtype).itemsize

    # --- Tiling decisions -------------------------------------------------
    # Lane-dense feature dim (multiple of 128). Production d_model usually
    # already qualifies -> no activation pad at all.
    dm_p = _round_up(d_model, 128)

    # Row tile: multiple of the dtype's sublane packing (8 f32 / 16 bf16 / 32 int8).
    sub = {4: 8, 2: 16, 1: 32}.get(w_isz, 8)
    tm = max(sub, (int(tile_m) // sub) * sub)
    tm = min(tm, _round_up(M, sub))
    # Keep >= 2 row tiles so the x/out pipeline has work to overlap and
    # megacore (v7x: 2 TCs) can split the "parallel" axis.
    if M > sub and pl.cdiv(M, tm) < 2:
        tm = max(sub, _round_up(pl.cdiv(M, 2), sub))

    # Hidden (contraction) tile: multiple of 128 (>=256 preferred for the
    # 2x256 MXU on v6e/v7x; 512 default).
    tk = max(128, (int(tile_k) // 128) * 128)
    tk = min(tk, _round_up(d_hidden, 128))

    # Shrink tiles until the estimated footprint fits this chip's VMEM.
    vmem_cap = _vmem_capacity_bytes()
    headroom = 8 << 20
    while _vmem_budget(tm, tk, dm_p, x_isz, w_isz, o_isz) > vmem_cap - headroom:
        if tk > 128:
            tk //= 2
        elif tm > 4 * sub:
            tm = max(sub, ((tm // 2) // sub) * sub)
        else:
            break

    dh_p = _round_up(d_hidden, tk)          # hidden padded to a multiple of tk
    grid = (pl.cdiv(M, tm), dh_p // tk)

    # --- Pad/cast weights & biases (zero padding is neutral through the FFN).
    # No row padding and no feature padding of x unless d_model % 128 != 0.
    x_p = x2d if dm_p == d_model else jnp.pad(x2d, ((0, 0), (0, dm_p - d_model)))
    w1_p = jnp.pad(w1.astype(compute_dtype),
                   ((0, dm_p - d_model), (0, dh_p - d_hidden)))
    w2_p = jnp.pad(w2.astype(compute_dtype),
                   ((0, dh_p - d_hidden), (0, dm_p - d_model)))
    b1_p = jnp.pad(b1.astype(jnp.float32), (0, dh_p - d_hidden)).reshape(1, dh_p)
    b2_p = jnp.pad(b2.astype(jnp.float32), (0, dm_p - d_model)).reshape(1, dm_p)

    vmem_limit = min(
        max(int(_vmem_budget(tm, tk, dm_p, x_isz, w_isz, o_isz) * 1.25) + (4 << 20),
            16 << 20),
        vmem_cap - headroom)

    cost = pl.CostEstimate(
        flops=4 * M * d_model * d_hidden,
        transcendentals=0,
        bytes_accessed=(M * d_model * (x_isz + o_isz)
                        + 2 * d_model * d_hidden * w_isz
                        + 4 * (d_model + d_hidden)))

    single = pl.Buffered(1)   # b2: constant index_map -> single buffer

    out2d = pl.pallas_call(
        _ffn_kernel,
        out_shape=jax.ShapeDtypeStruct((M, dm_p), out_dtype),
        grid_spec=pltpu.PrefetchScalarGridSpec(
            num_scalar_prefetch=0,
            grid=grid,
            in_specs=[
                pl.BlockSpec((tm, dm_p), lambda i, k: (i, 0)),   # x tile (resident over k)
                pl.BlockSpec((dm_p, tk), lambda i, k: (0, k)),   # W1 K-stream
                pl.BlockSpec((1, tk), lambda i, k: (0, k)),      # b1 K-stream
                pl.BlockSpec((tk, dm_p), lambda i, k: (k, 0)),   # W2 K-stream
                pl.BlockSpec((1, dm_p), lambda i, k: (0, 0),
                             pipeline_mode=single),              # b2 resident
            ],
            out_specs=pl.BlockSpec((tm, dm_p), lambda i, k: (i, 0)),
            scratch_shapes=[pltpu.VMEM((tm, dm_p), jnp.float32)],
        ),
        compiler_params=pltpu.CompilerParams(
            dimension_semantics=("parallel", "arbitrary"),
            vmem_limit_bytes=int(vmem_limit),
        ),
        cost_estimate=cost,
    )(x_p, w1_p, b1_p, w2_p, b2_p)

    if dm_p != d_model:
        out2d = out2d[:, :d_model]
    return out2d.reshape(batch, seq, d_model)


if __name__ == "__main__":
    # Small deterministic setup consistent with the module:
    # d_model=32, d_hidden=64, input (batch=2, seq=8, d_model=32).
    batch, seq, d_model, d_hidden = 2, 8, 32, 64
    key = jax.random.PRNGKey(0)
    kx, k1, k2, k3, k4 = jax.random.split(key, 5)

    x = jax.random.normal(kx, (batch, seq, d_model), dtype=jnp.float32)

    # Deterministic "Linear" params (stored pre-transposed: in x out).
    w1 = jax.random.normal(k1, (d_model, d_hidden), dtype=jnp.float32) * 0.1
    b1 = jax.random.normal(k2, (d_hidden,), dtype=jnp.float32) * 0.1
    w2 = jax.random.normal(k3, (d_hidden, d_model), dtype=jnp.float32) * 0.1
    b2 = jax.random.normal(k4, (d_model,), dtype=jnp.float32) * 0.1

    ref = jnp.maximum(x @ w1 + b1, 0.0) @ w2 + b2

    # f32 MXU-operand path (matches the PyTorch reference tightly).
    out = position_wise_feed_forward(x, w1, b1, w2, b2)
    out = jax.block_until_ready(out)
    assert out.shape == (batch, seq, d_model)
    assert jnp.allclose(out, ref, atol=1e-5, rtol=1e-5), "mismatch vs reference (f32)"

    # bf16 MXU-operand fast path (production default; f32 accumulation kept).
    out_bf16 = position_wise_feed_forward(x, w1, b1, w2, b2,
                                          compute_dtype=jnp.bfloat16)
    out_bf16 = jax.block_until_ready(out_bf16)
    assert jnp.allclose(out_bf16, ref, atol=5e-2, rtol=5e-2), "mismatch vs reference (bf16)"

    print("KERNEL_OK")
</pallas_src>

<mosaic_0001>
module attributes {stable_mosaic.version = 11 : i64} {
  func.func @_ffn_kernel(%arg0: i32, %arg1: i32, %arg2: memref<8x128xf32, #tpu.memory_space<vmem>>, %arg3: memref<128x128xf32, #tpu.memory_space<vmem>>, %arg4: memref<1x128xf32, #tpu.memory_space<vmem>>, %arg5: memref<128x128xf32, #tpu.memory_space<vmem>>, %arg6: memref<1x128xf32, #tpu.memory_space<vmem>>, %arg7: memref<8x128xf32, #tpu.memory_space<vmem>>, %arg8: memref<8x128xf32, #tpu.memory_space<vmem>>) attributes {dimension_semantics = [#tpu.dimension_semantics<parallel>, #tpu.dimension_semantics<arbitrary>], iteration_bounds = array<i64: 2, 1>, scalar_prefetch = 0 : i64, scratch_operands = 1 : i64, tpu.core_type = #tpu.core_type<tc>, window_params = [{transform_indices = @transform_0, window_bounds = array<i64: 8, 128>}, {transform_indices = @transform_1, window_bounds = array<i64: 128, 128>}, {transform_indices = @transform_2, window_bounds = array<i64: 1, 128>}, {transform_indices = @transform_3, window_bounds = array<i64: 128, 128>}, {pipeline_mode = #tpu.pipeline_mode<synchronous>, transform_indices = @transform_4, window_bounds = array<i64: 1, 128>}, {transform_indices = @transform_5, window_bounds = array<i64: 8, 128>}]} {
    %c0_i32 = arith.constant 0 : i32
    %0 = arith.cmpi eq, %arg1, %c0_i32 : i32
    %1 = arith.extui %0 : i1 to i32
    %c0_i32_0 = arith.constant 0 : i32
    %2 = arith.cmpi ne, %1, %c0_i32_0 : i32
    scf.if %2 {
      %cst_16 = arith.constant 0.000000e+00 : f32
      %19 = vector.broadcast %cst_16 : f32 to vector<8x128xf32>
      %c0_17 = arith.constant 0 : index
      %c0_18 = arith.constant 0 : index
      %20 = vector.load %arg8[%c0_17, %c0_18] : memref<8x128xf32, #tpu.memory_space<vmem>>, vector<8x128xf32>
      tpu.vector_store %arg8[%c0_17, %c0_18], %19 {strides = array<i32>} : memref<8x128xf32, #tpu.memory_space<vmem>>, vector<8x128xf32>,
    } else {
    }
    %c0 = arith.constant 0 : index
    %c0_1 = arith.constant 0 : index
    %3 = vector.load %arg2[%c0, %c0_1] : memref<8x128xf32, #tpu.memory_space<vmem>>, vector<8x128xf32>
    %c0_2 = arith.constant 0 : index
    %c0_3 = arith.constant 0 : index
    %4 = vector.load %arg3[%c0_2, %c0_3] : memref<128x128xf32, #tpu.memory_space<vmem>>, vector<128x128xf32>
    %cst = arith.constant dense<0.000000e+00> : vector<8x128xf32>
    %5 = tpu.matmul %3, %4, %cst {dimension_numbers = #tpu.dot_dimension_numbers<[1], [0], [0], [1], [0, 0, 1, 1], [], []>} : vector<8x128xf32>, vector<128x128xf32>, vector<8x128xf32> -> vector<8x128xf32>
    %c0_4 = arith.constant 0 : index
    %c0_5 = arith.constant 0 : index
    %6 = vector.load %arg4[%c0_4, %c0_5] : memref<1x128xf32, #tpu.memory_space<vmem>>, vector<1x128xf32>
    %7 = vector.broadcast %6 : vector<1x128xf32> to vector<8x128xf32>
    %8 = arith.addf %5, %7 : vector<8x128xf32>
    %cst_6 = arith.constant 0.000000e+00 : f32
    %9 = vector.broadcast %cst_6 : f32 to vector<8x128xf32>
    %10 = arith.maximumf %8, %9 : vector<8x128xf32>
    %c0_7 = arith.constant 0 : index
    %c0_8 = arith.constant 0 : index
    %11 = vector.load %arg8[%c0_7, %c0_8] : memref<8x128xf32, #tpu.memory_space<vmem>>, vector<8x128xf32>
    %c0_9 = arith.constant 0 : index
    %c0_10 = arith.constant 0 : index
    %12 = vector.load %arg5[%c0_9, %c0_10] : memref<128x128xf32, #tpu.memory_space<vmem>>, vector<128x128xf32>
    %cst_11 = arith.constant dense<0.000000e+00> : vector<8x128xf32>
    %13 = tpu.matmul %10, %12, %cst_11 {dimension_numbers = #tpu.dot_dimension_numbers<[1], [0], [0], [1], [0, 0, 1, 1], [], []>} : vector<8x128xf32>, vector<128x128xf32>, vector<8x128xf32> -> vector<8x128xf32>
    %14 = arith.addf %11, %13 : vector<8x128xf32>
    %c0_12 = arith.constant 0 : index
    %c0_13 = arith.constant 0 : index
    %15 = vector.load %arg8[%c0_12, %c0_13] : memref<8x128xf32, #tpu.memory_space<vmem>>, vector<8x128xf32>
    tpu.vector_store %arg8[%c0_12, %c0_13], %14 {strides = array<i32>} : memref<8x128xf32, #tpu.memory_space<vmem>>, vector<8x128xf32>,
    %c0_i32_14 = arith.constant 0 : i32
    %16 = arith.cmpi eq, %arg1, %c0_i32_14 : i32
    %17 = arith.extui %16 : i1 to i32
    %c0_i32_15 = arith.constant 0 : i32
    %18 = arith.cmpi ne, %17, %c0_i32_15 : i32
    scf.if %18 {
      %c0_16 = arith.constant 0 : index
      %c0_17 = arith.constant 0 : index
      %19 = vector.load %arg8[%c0_16, %c0_17] : memref<8x128xf32, #tpu.memory_space<vmem>>, vector<8x128xf32>
      %c0_18 = arith.constant 0 : index
      %c0_19 = arith.constant 0 : index
      %20 = vector.load %arg6[%c0_18, %c0_19] : memref<1x128xf32, #tpu.memory_space<vmem>>, vector<1x128xf32>
      %21 = vector.broadcast %20 : vector<1x128xf32> to vector<8x128xf32>
      %22 = arith.addf %19, %21 : vector<8x128xf32>
      %c0_20 = arith.constant 0 : index
      %c0_21 = arith.constant 0 : index
      %23 = vector.load %arg7[%c0_20, %c0_21] : memref<8x128xf32, #tpu.memory_space<vmem>>, vector<8x128xf32>
      tpu.vector_store %arg7[%c0_20, %c0_21], %22 {strides = array<i32>} : memref<8x128xf32, #tpu.memory_space<vmem>>, vector<8x128xf32>,
    } else {
    }
    return
  }
  func.func @transform_0(%arg0: i32, %arg1: i32) -> (i32, i32) {
    %c0_i32 = arith.constant 0 : i32
    %c0_i32_0 = arith.constant 0 : i32
    return %arg0, %c0_i32 : i32, i32
  }
  func.func @transform_1(%arg0: i32, %arg1: i32) -> (i32, i32) {
    %c0_i32 = arith.constant 0 : i32
    %c0_i32_0 = arith.constant 0 : i32
    return %c0_i32, %arg1 : i32, i32
  }
  func.func @transform_2(%arg0: i32, %arg1: i32) -> (i32, i32) {
    %c0_i32 = arith.constant 0 : i32
    %c0_i32_0 = arith.constant 0 : i32
    return %c0_i32, %arg1 : i32, i32
  }
  func.func @transform_3(%arg0: i32, %arg1: i32) -> (i32, i32) {
    %c0_i32 = arith.constant 0 : i32
    %c0_i32_0 = arith.constant 0 : i32
    return %arg1, %c0_i32 : i32, i32
  }
  func.func @transform_4(%arg0: i32, %arg1: i32) -> (i32, i32) {
    %c0_i32 = arith.constant 0 : i32
    %c0_i32_0 = arith.constant 0 : i32
    %c0_i32_1 = arith.constant 0 : i32
    return %c0_i32, %c0_i32_0 : i32, i32
  }
  func.func @transform_5(%arg0: i32, %arg1: i32) -> (i32, i32) {
    %c0_i32 = arith.constant 0 : i32
    %c0_i32_0 = arith.constant 0 : i32
    return %arg0, %c0_i32 : i32, i32
  }
}

</mosaic_0001>

<bundles_post_ra>
// kernel: tpu_custom_call.1
= control target key start
LH: loop header
LB: loop body
LE: loop exit
PB: predicated region body
PF: predicated region fallthrough
CT: control target
= control target key end

     0   :  { %10 = vsyncpa [#allocation4], 0  ;;  %s1016_s0 = inlined_call_operand.hbm [shape: f32[16,128], index: 0, kind: input, shape index: {}]   ;;  %s1017_s1 = inlined_call_operand.hbm [shape: f32[128,128], index: 1, kind: input, shape index: {}]   ;;  %s1018_s2 = inlined_call_operand.vmem [shape: f32[1,128], index: 2, kind: input, shape index: {}]   ;;  %s1019_s3 = inlined_call_operand.hbm [shape: f32[128,128], index: 3, kind: input, shape index: {}]   ;;  %s1020_s4 = inlined_call_operand.vmem [shape: f32[1,128], index: 4, kind: input, shape index: {}]   ;;  %s1021_s5 = inlined_call_operand.hbm [shape: f32[16,128], index: 5, kind: output, shape index: {}]  }
   0x1   :  { %12 = vsyncpa [#allocation4 + $0x1], 0 }
   0x2   :  { %13 = vsyncpa [#allocation7], 0 }
   0x3   :  { %14 = vsyncpa [#allocation5], 0 }
   0x4   :  { %16 = vsyncpa [#allocation5 + $0x1], 0  ;;  %s859_s18 = smov 0   ;;  %s861_s19 = smov 0  }
   0x5   :  { %s863_s20 = smov 0   ;;  %s865_s21 = smov 0  }
   0x6   :  { %s867_s22 = smov 0   ;;  %s869_s23 = smov 0  }
   0x7 LB: > { %s542_s24 = sadd.s32 4294967295, %s823_s23   ;;  %p544_p0 = scmp.ge.s32.totalorder %s823_s23, 1  ;;  %s823_s23 = sphi %s869_s23, %s22_s23   ;;  %s819_s22 = sphi %s867_s22, %s1031_s22   ;;  %s815_s21 = sphi %s865_s21, %s1030_s21   ;;  %s811_s20 = sphi %s863_s20, %s1029_s20   ;;  %s807_s19 = sphi %s861_s19, %s1028_s19   ;;  %s803_s18 = sphi %s859_s18, %s1027_s18  }
   0x8   : > { %p893_p1 = scmp.eq.s32.totalorder %s542_s24, 0  ;;  %p190_p2 = scmp.lt.s32.totalorder %s823_s23, 3 }
   0x9   : > { %s203_s28 = sshll.u32 %s1017_s1, 4  ;;  %s825_s30 = smov [#allocation6]   ;;  %s204_s28 = int_to_ptr.hbm [resolvable:$true] %s203_s28 }
   0xa   : > { %p901_p3 = pnand %p544_p0, %p190_p2  ;;  %s205_s6 = sshll.u32 %s825_s30, 4  ;;  %s206_s6 = int_to_ptr.vmem [resolvable:$true] %s205_s6 }
   0xb   : > { %p548_p6 = scmp.ge.s32.totalorder %s823_s23, 2  ;;  %s226_s9 = sshll.u32 %s1019_s3, 4  ;;  %s227_s9 = int_to_ptr.hbm [resolvable:$true] %s226_s9 }
   0xc   : > { %p572_p4 = pneg %p901_p3  ;;  %s826_s10 = smov 128  }
   0xd   : > { %s827_s11 = smov 8   ;;  %s828_s12 = smov [#allocation8]  }
   0xe   : > { %p573_p5 = pnand %p572_p4, %p893_p1  ;;  %s228_s13 = sshll.u32 %s828_s12, 4  ;;  %s229_s13 = int_to_ptr.vmem [resolvable:$true] %s228_s13 }
   0xf   : > { %s34_s14 = sadd.s32 1, %s819_s22  ;;  %s543_s15 = sadd.s32 4294967294, %s823_s23  }
  0x10   : > { %575 = dma.hbm_to_vmem [thread:$0]  (!%p573_p5), %s204_s28, 2048, %s206_s6, [#allocation7], %s826_s10, %s826_s10, %s827_s11  }
  0x11   : > { %578 = dma.hbm_to_vmem [thread:$0]  (!%p573_p5), %s227_s9, 2048, %s229_s13, [#allocation7], %s826_s10, %s826_s10, %s827_s11  }
  0x12   : > { %p36_p7 = scmp.ge.s32.totalorder %s34_s14, 2  ;;  %s41_s16 = sadd.s32 1, %s811_s20 }
  0x13   : > { %p48_p8 = scmp.ne.s32.totalorder %s811_s20, %s807_s19  ;;  %p49_p9 = scmp.eq.s32.totalorder %s823_s23, 0 }
  0x14   : > { %s1033_s14 = smov (%p36_p7, %s34_s14), 0  ;;  %p54_p10 = scmp.ne.s32.totalorder %s807_s19, %s803_s18 }
  0x15   : > { %s38_s17 = ssub.s32 %s819_s22, %s1033_s14  ;;  %p177_p11 = scmp.eq.s32.totalorder %s542_s24, 1 }
  0x16   : > { %p39_p12 = scmp.eq.s32.totalorder %s38_s17, 0  ;;  %p929_p13 = por %p893_p1, %p54_p10 }
  0x17   : > { %p933_p0 = por %p177_p11, %p48_p8  ;;  %p183_p2 = scmp.eq.s32.totalorder %s543_s15, 1 }
  0x18   : > { %s938_s28 = scalar_select %p39_p12, %s811_s20, %s41_s16  }
  0x19   : > { %p50_p4 = por %p49_p9, %p48_p8  ;;  %p940_p5 = por %p183_p2, %p54_p10 }
  0x1a   : > { %s245_s6 = sand.u32 1, %s811_s20   ;;  %s550_s24 = sshll.u32 %s819_s22, 3 }
  0x1b   : > { %p589_p7 = scmp.lt.s32.totalorder %s823_s23, 2  ;;  %s549_s7 = sshll.u32 %s245_s6, 3 }
  0x1c   : > { %s253_s10 = scalar_lea.hbm %s1016_s0, %s550_s24  ;;  %s249_s12 = scalar_lea.vmem [#allocation3], %s549_s7 }
  0x1d   : > { %s255_s11 = sshll.u32 %s253_s10, 4  ;;  %s257_s13 = sshll.u32 %s249_s12, 4  ;;  %s256_s11 = int_to_ptr.hbm [resolvable:$true] %s255_s11  ;;  %s258_s13 = int_to_ptr.vmem [resolvable:$true] %s257_s13 }
  0x1e   : > { %p580_p11 = pnand %p589_p7, %p50_p4  ;;  %s246_s15 = scalar_lea.sflag [#allocation4], %s245_s6 }
  0x1f   : > { %266 = sbr.rel (%p901_p3) target bundleno = 332 (0x14c), region = 40  ;;  %s953_s16 = sand.u32 (!%p901_p3), 1, %s807_s19  }
  0x20   : > { %582 = dma.hbm_to_vmem [thread:$0]  (!%p580_p11), %s256_s11, 128, %s258_s13, %s246_s15  }
  0x21   : > { %s552_s17 = sshll.u32 (!%p901_p3), %s953_s16, 3  ;;  %s269_s24 = scalar_lea.sflag (!%p901_p3), [#allocation4], %s953_s16 }
  0x22   : > { %s959_s7 = scalar_lea.vmem (!%p901_p3), [#allocation3], %s552_s17 }
  0x24   : > { %790 = dma.done.wait (%p929_p13), %s269_s24, 128  }
  0x25   : > { %792 = vsyncadd (%p929_p13), %s269_s24, 4294967168 }
  0x26   : > { %794 = dma.done.wait (%p893_p1), [#allocation7], 4096  }
  0x27   : > { %796 = vsyncadd (%p893_p1), [#allocation7], 4294963200  ;;  %v338_v0 = vld [vmem:[#allocation6 + $0x78] sm:$0xff]  ;;  %v337_v1 = vld [vmem:[#allocation6 + $0x70] sm:$0xff]  ;;  %s557_s26 = sshll.u32 %s815_s21, 3  ;;  %s312_s12 = scalar_lea.vmem [#allocation9], %s552_s17 }
  0x28   : > { %343 = vmatpush.msra.mxu0 %v338_v0  ;;  %v336_v2 = vld [vmem:[#allocation6 + $0x68] sm:$0xff]  ;;  %v335_v3 = vld [vmem:[#allocation6 + $0x60] sm:$0xff]  ;;  %v380_v4 = vld [vmem:[#allocation8 + $0x78] sm:$0xff]  ;;  %s424_s9 = scalar_lea.hbm %s1021_s5, %s557_s26  ;;  %s426_s13 = sshll.u32 %s312_s12, 4  ;;  %s427_s13 = int_to_ptr.vmem [resolvable:$true] %s426_s13 }
  0x29   : > { %v334_v5 = vld [vmem:[#allocation6 + $0x58] sm:$0xff]  ;;  %381 = vmatpush.msra.mxu1 %v380_v4  ;;  %v379_v6 = vld [vmem:[#allocation8 + $0x70] sm:$0xff]  ;;  %v378_v7 = vld [vmem:[#allocation8 + $0x68] sm:$0xff]  ;;  %s428_s15 = sshll.u32 %s424_s9, 4  ;;  %s414_s24 = scalar_lea.sflag [#allocation5], %s953_s16  ;;  %s429_s15 = int_to_ptr.hbm [resolvable:$true] %s428_s15 }
  0x2a   : > { %344 = vmatpush.msra.mxu0 %v337_v1  ;;  %v333_v8 = vld [vmem:[#allocation6 + $0x50] sm:$0xff]  ;;  %v377_v9 = vld [vmem:[#allocation8 + $0x60] sm:$0xff]  ;;  %v332_v10 = vld [vmem:[#allocation6 + $0x48] sm:$0xff]  ;;  %s751_s21 = sshra.s32 %s429_s15, 4  ;;  %s757_s26 = scalar_lea.hbm %s1021_s5, 16  ;;  %s752_s21 = int_to_ptr.hbm [resolvable:$true] %s751_s21 }
  0x2b   : > { %382 = vmatpush.msra.mxu1 %v379_v6  ;;  %v376_v11 = vld [vmem:[#allocation8 + $0x58] sm:$0xff]  ;;  %v331_v12 = vld [vmem:[#allocation6 + $0x40] sm:$0xff]  ;;  %v375_v13 = vld [vmem:[#allocation8 + $0x50] sm:$0xff]  ;;  %p758_p9 = scmp.lt.s32.totalorder %s752_s21, %s1021_s5 }
  0x2c   : > { %345 = vmatpush.msra.mxu0 %v336_v2  ;;  %v330_v14 = vld [vmem:[#allocation6 + $0x38] sm:$0xff]  ;;  %v374_v15 = vld [vmem:[#allocation8 + $0x48] sm:$0xff]  ;;  %v329_v16 = vld [vmem:[#allocation6 + $0x30] sm:$0xff] }
  0x2d   : > { %383 = vmatpush.msra.mxu1 %v378_v7  ;;  %v373_v17 = vld [vmem:[#allocation8 + $0x40] sm:$0xff]  ;;  %v328_v18 = vld [vmem:[#allocation6 + $0x28] sm:$0xff]  ;;  %v372_v19 = vld [vmem:[#allocation8 + $0x38] sm:$0xff] }
  0x2e   : > { %346 = vmatpush.msra.mxu0 %v335_v3  ;;  %v327_v20 = vld [vmem:[#allocation6 + $0x20] sm:$0xff]  ;;  %v371_v21 = vld [vmem:[#allocation8 + $0x30] sm:$0xff]  ;;  %v326_v22 = vld [vmem:[#allocation6 + $0x18] sm:$0xff] }
  0x2f   : > { %384 = vmatpush.msra.mxu1 %v377_v9  ;;  %v370_v23 = vld [vmem:[#allocation8 + $0x28] sm:$0xff]  ;;  %v325_v24 = vld [vmem:[#allocation6 + $0x10] sm:$0xff]  ;;  %v369_v25 = vld [vmem:[#allocation8 + $0x20] sm:$0xff] }
  0x30   : > { %347 = vmatpush.msra.mxu0 %v334_v5  ;;  %v324_v26 = vld [vmem:[#allocation6 + $0x8] sm:$0xff]  ;;  %v368_v27 = vld [vmem:[#allocation8 + $0x18] sm:$0xff]  ;;  %v323_v28 = vld [vmem:[#allocation6] sm:$0xff] }
  0x31   : > { %385 = vmatpush.msra.mxu1 %v376_v11  ;;  %v322_v29 = vld [vmem:[%s959_s7] sm:$0xff]  ;;  %v366_v31 = vld [vmem:[#allocation8 + $0x8] sm:$0xff]  ;;  %v365_v32 = vld [vmem:[#allocation8] sm:$0xff]  ;;  %s753_s7 = scalar_lea.hbm %s752_s21, 8 }
  0x32   : > { %348 = vmatpush.msra.mxu0 %v333_v8  ;;  %v367_v30 = vld [vmem:[#allocation8 + $0x10] sm:$0xff]  ;;  %p754_p1 = scmp.ne.s32.totalorder %s752_s21, %s753_s7  ;;  %p759_p10 = scmp.lt.s32.totalorder %s757_s26, %s753_s7 }
  0x33   : > { %386 = vmatpush.msra.mxu1 %v375_v13  ;;  %v645_v33 = vld [vmem:[%s1018_s2] ss:$0 sm:$0xff] }
  0x34   : > { %349 = vmatpush.msra.mxu0 %v332_v10  ;;  %v646_v37 = vld [vmem:[%s1020_s4] ss:$0 sm:$0xff]  ;;  %p755_p3 = pnand %p754_p1, %p933_p0  ;;  %p760_p12 = por %p759_p10, %p758_p9 }
  0x35   : > { %387 = vmatpush.msra.mxu1 %v374_v15 }
  0x36   : > { %350 = vmatpush.msra.mxu0 %v331_v12  ;;  %p756_p8 = pneg %p755_p3 }
  0x37   : > { %388 = vmatpush.msra.mxu1 %v373_v17 }
  0x38   : > { %351 = vmatpush.msra.mxu0 %v330_v14  ;;  %p761_p13 = pnand %p760_p12, %p756_p8 }
  0x39   : > { %389 = vmatpush.msra.mxu1 %v372_v19 }
  0x3a   : > { %352 = vmatpush.msra.mxu0 %v329_v16 }
  0x3b   : > { %390 = vmatpush.msra.mxu1 %v371_v21 }
  0x3c   : > { %353 = vmatpush.msra.mxu0 %v328_v18 }
  0x3d   : > { %391 = vmatpush.msra.mxu1 %v370_v23 }
  0x3e   : > { %354 = vmatpush.msra.mxu0 %v327_v20 }
  0x3f   : > { %392 = vmatpush.msra.mxu1 %v369_v25 }
  0x40   : > { %355 = vmatpush.msra.mxu0 %v326_v22 }
  0x41   : > { %393 = vmatpush.msra.mxu1 %v368_v27 }
  0x42   : > { %356 = vmatpush.msra.mxu0 %v325_v24 }
  0x43   : > { %394 = vmatpush.msra.mxu1 %v367_v30 }
  0x44   : > { %357 = vmatpush.msra.mxu0 %v324_v26 }
  0x45   : > { %395 = vmatpush.msra.mxu1 %v366_v31 }
  0x46   : > { %358 = vmatpush.msra.mxu0 %v323_v28 }
  0x47   : > { %359 = vmatmul.f32.vlgmr.msra.gmra.mxu0 %v322_v29  ;;  %396 = vmatpush.msra.mxu1 %v365_v32 }
  0xc4   : > { %v360_v34 = vpop.f32.mrf.mxu0 }
  0xc5   : > { %v361_v35 = vadd.f32 %v645_v33, %v360_v34 }
  0xc7   : > { %v363_v36 = vmax.f32 %v361_v35, 0.0 }
  0xc9   : > { %397 = vmatmul.f32.vlgmr.msra.gmra.mxu1 %v363_v36 }
 0x146   : > { %v398_v38 = vpop.f32.mrf.mxu1 }
 0x147   : > { %v411_v39 = vadd.f32 %v646_v37, %v398_v38 }
 0x149   : > { %412 = vst [vmem:[%s312_s12] sm:$0xff] %v411_v39 }
 0x14a   : > { %764 = shalt.err (!%p761_p13)
}
 0x14b   : > { %570 = dma.vmem_to_hbm [thread:$0]  (%p933_p0), %s427_s13, 128, %s429_s15, %s414_s24  }
 0x14c PF: > { %s440_s16 = sand.u32 1, %s803_s18   ;;  %p584_p2 = pnand %p548_p6, %p940_p5 }
 0x14d   : > { %s441_s8 = scalar_lea.sflag [#allocation5], %s440_s16 }
 0x14e   : > { %p585_p4 = pneg %p584_p2 }
 0x150   : > { %798 = dma.done.wait (%p585_p4), %s441_s8, 128  }
 0x151   : > { %800 = vsyncadd (%p585_p4), %s441_s8, 4294967168  ;;  %s22_s23 = sadd.s32 1, %s823_s23   ;;  %s1027_s18 = smov %s807_s19 }
 0x152   : > { %p19_p7 = scmp.ge.s32.totalorder %s22_s23, 4   ;;  %s1028_s19 = smov %s811_s20 }
 0x153   : > { %s1029_s20 = smov %s938_s28  ;;  %s1030_s21 = smov %s819_s22 }
 0x154   : > { %s1031_s22 = smov %s1033_s14  ;;  %21 = sbr.rel (!%p19_p7) target bundleno = 7 (0x7), region = 106 }
 0x159   :  { %447 = vsyncpa [#allocation4], 1 }
 0x15a   :  { %449 = vsyncpa [#allocation4 + $0x1], 1 }
 0x15b   :  { %450 = vsyncpa [#allocation7], 1 }
 0x15c   :  { %451 = vsyncpa [#allocation5], 1 }
 0x15d   :  { %453 = vsyncpa [#allocation5 + $0x1], 1 }

</bundles_post_ra>
